<compile_context>
chip_gen: v6e
topology: v6e:2x2x1
jax: 0.10.0
libtpu: 0.0.40
codegen_flags: <defaults>
</compile_context>

<pallas_src>
import functools

import jax
import jax.numpy as jnp
from jax.experimental import pallas as pl
from jax.experimental.pallas import tpu as pltpu

KERNEL_SIZE = 9
LN_EPS = 1e-5  # torch.nn.LayerNorm default


def _gelu(x):
    # exact (erf) GELU — matches torch.nn.GELU() default (approximate='none')
    return 0.5 * x * (1.0 + jax.lax.erf(x * 0.7071067811865476))


def _layernorm(x, gamma, beta):
    mean = jnp.mean(x, axis=-1, keepdims=True)
    var = jnp.mean(jnp.square(x - mean), axis=-1, keepdims=True)
    inv = jax.lax.rsqrt(var + LN_EPS)
    return (x - mean) * inv * gamma + beta


def conv_layer_kernel(xpad_hbm, wconv_ref, bconv_ref, g1_ref, b1_ref,
                      wlin_ref, blin_ref, g2_ref, b2_ref, o_ref,
                      xbuf, sem, *, dilation, pad, tile_l):
    b = pl.program_id(0)
    i = pl.program_id(1)

    # ---- fetch the halo'd activation tile: rows [i*TL, i*TL + TL + 2*pad) of
    #      the padded array == original rows [i*TL - pad, i*TL + TL + pad)
    start = pl.multiple_of(i * tile_l, 8)
    cp = pltpu.make_async_copy(
        xpad_hbm.at[b, pl.ds(start, tile_l + 2 * pad), :],
        xbuf, sem.at[0])
    cp.start()
    cp.wait()

    xh = xbuf[...]                               # (TL + 2*pad, H) f32, loaded once
    xh_bf = xh.astype(jnp.bfloat16)              # cast once for the MXU
    H = xh.shape[1]
    x = xh[pad:pad + tile_l, :]                  # residual base (un-padded rows)

    # ---- conv branch: 'same' dilated conv, k=9, as 9 tap matmuls (bf16 -> f32 acc)
    acc = jnp.zeros((tile_l, H), jnp.float32)
    for t in range(KERNEL_SIZE):
        xs = xh_bf[t * dilation:t * dilation + tile_l, :]   # static shifted view
        acc = acc + jnp.dot(xs, wconv_ref[t],
                            preferred_element_type=jnp.float32)
    acc = acc + bconv_ref[...]
    conv_out = _layernorm(_gelu(acc), g1_ref[...], b1_ref[...])
    h = x + conv_out                                        # residual 1

    # ---- ffn branch: Linear -> GELU -> LayerNorm (bf16 matmul, f32 elementwise)
    ffn = jnp.dot(h.astype(jnp.bfloat16), wlin_ref[...],
                  preferred_element_type=jnp.float32)
    ffn = ffn + blin_ref[...]
    ffn = _layernorm(_gelu(ffn), g2_ref[...], b2_ref[...])

    o_ref[...] = (h + ffn).astype(o_ref.dtype)              # residual 2


def convolution_layer(x, params, dilation):
    """x: (B, L, H) float32. Returns (B, L, H)."""
    B, L, H = x.shape
    pad = (KERNEL_SIZE - 1) // 2 * dilation                 # 'same' padding (k odd)

    def round_up(a, m):
        return (a + m - 1) // m * m

    # L tile: multiple of 8 (sublane), capped at 512 to bound VMEM on all gens.
    TL = min(512, round_up(L, 8))
    Lr = round_up(L, TL)
    n_l = Lr // TL

    # Single padded activation array: 'same' left pad + ('same' right pad +
    # L-rounding zeros).  Zero rows beyond L reproduce the conv's zero padding,
    # and the extra output rows are sliced off below, so results are exact.
    x_pad = jnp.pad(x, ((0, 0), (pad, (Lr - L) + pad), (0, 0)))

    # torch Conv1d weight (Cout, Cin, K) -> (K, Cin, Cout); torch Linear (out, in) -> (in, out)
    w_conv = jnp.transpose(params["conv_w"], (2, 1, 0)).astype(jnp.bfloat16)
    w_lin = params["lin_w"].T.astype(jnp.bfloat16)
    vec = lambda v: v.reshape(1, H).astype(jnp.float32)

    kernel = functools.partial(conv_layer_kernel,
                               dilation=dilation, pad=pad, tile_l=TL)

    flops = 2 * B * Lr * H * H * (KERNEL_SIZE + 1)
    bytes_accessed = (x_pad.size + B * Lr * H) * 4 + (w_conv.size + w_lin.size) * 2
    cost = pl.CostEstimate(flops=flops,
                           transcendentals=2 * B * Lr * H,
                           bytes_accessed=bytes_accessed)

    # NOTE: weight/bias blocks have constant index maps; Pallas keeps them
    # resident across the grid.  (pipeline_mode=pl.Buffered(1) could reclaim the
    # second buffer if VMEM gets tight at larger H.)
    out = pl.pallas_call(
        kernel,
        out_shape=jax.ShapeDtypeStruct((B, Lr, H), x.dtype),
        grid=(B, n_l),
        in_specs=[
            pl.BlockSpec(memory_space=pl.ANY),                         # x_pad stays in HBM
            pl.BlockSpec((KERNEL_SIZE, H, H), lambda b, i: (0, 0, 0)),  # conv taps (bf16)
            pl.BlockSpec((1, H), lambda b, i: (0, 0)),                 # conv bias
            pl.BlockSpec((1, H), lambda b, i: (0, 0)),                 # ln1 gamma
            pl.BlockSpec((1, H), lambda b, i: (0, 0)),                 # ln1 beta
            pl.BlockSpec((H, H), lambda b, i: (0, 0)),                 # linear weight (bf16)
            pl.BlockSpec((1, H), lambda b, i: (0, 0)),                 # linear bias
            pl.BlockSpec((1, H), lambda b, i: (0, 0)),                 # ln2 gamma
            pl.BlockSpec((1, H), lambda b, i: (0, 0)),                 # ln2 beta
        ],
        out_specs=pl.BlockSpec((None, TL, H), lambda b, i: (b, i, 0)),
        scratch_shapes=[
            pltpu.VMEM((TL + 2 * pad, H), x.dtype),   # halo'd activation tile
            pltpu.SemaphoreType.DMA((1,)),
        ],
        compiler_params=pltpu.CompilerParams(
            dimension_semantics=("parallel", "parallel"),
            vmem_limit_bytes=48 * 1024 * 1024),
        cost_estimate=cost,
    )(x_pad, w_conv, vec(params["conv_b"]),
      vec(params["ln1_g"]), vec(params["ln1_b"]),
      w_lin, vec(params["lin_b"]),
      vec(params["ln2_g"]), vec(params["ln2_b"]))

    return out[:, :L, :]


def init_params(key, hidden_size):
    k1, k2, k3, k4 = jax.random.split(key, 4)
    scale = 1.0 / jnp.sqrt(hidden_size)
    return {
        # torch Conv1d layout: (Cout, Cin, K)
        "conv_w": jax.random.normal(k1, (hidden_size, hidden_size, KERNEL_SIZE),
                                    jnp.float32) * scale,
        "conv_b": jax.random.normal(k2, (hidden_size,), jnp.float32) * scale,
        # LayerNorm init matches torch defaults (ones / zeros)
        "ln1_g": jnp.ones((hidden_size,), jnp.float32),
        "ln1_b": jnp.zeros((hidden_size,), jnp.float32),
        # torch Linear layout: (out, in)
        "lin_w": jax.random.normal(k3, (hidden_size, hidden_size),
                                   jnp.float32) * scale,
        "lin_b": jax.random.normal(k4, (hidden_size,), jnp.float32) * scale,
        "ln2_g": jnp.ones((hidden_size,), jnp.float32),
        "ln2_b": jnp.zeros((hidden_size,), jnp.float32),
    }


if __name__ == "__main__":
    B, L, H = 2, 16, 32   # small shapes; module default hidden_size=512
    dilation = 2

    key = jax.random.PRNGKey(0)
    kx, kp = jax.random.split(key)
    x = jax.random.normal(kx, (B, L, H), jnp.float32)
    params = init_params(kp, H)

    out = convolution_layer(x, params, dilation)
    out = jax.block_until_ready(out)
    assert out.shape == (B, L, H) and out.dtype == jnp.float32
    print("KERNEL_OK")
</pallas_src>

<mosaic_0001>
module attributes {stable_mosaic.version = 11 : i64} {
  func.func @conv_layer_kernel(%arg0: i32, %arg1: i32, %arg2: memref<2x32x32xf32, #tpu.memory_space<any>>, %arg3: memref<9x32x32xbf16, #tpu.memory_space<vmem>>, %arg4: memref<1x32xf32, #tpu.memory_space<vmem>>, %arg5: memref<1x32xf32, #tpu.memory_space<vmem>>, %arg6: memref<1x32xf32, #tpu.memory_space<vmem>>, %arg7: memref<32x32xbf16, #tpu.memory_space<vmem>>, %arg8: memref<1x32xf32, #tpu.memory_space<vmem>>, %arg9: memref<1x32xf32, #tpu.memory_space<vmem>>, %arg10: memref<1x32xf32, #tpu.memory_space<vmem>>, %arg11: memref<1x16x32xf32, #tpu.memory_space<vmem>>, %arg12: memref<32x32xf32, #tpu.memory_space<vmem>>, %arg13: memref<1x!tpu.dma_semaphore, #tpu.memory_space<semaphore_mem>>) attributes {dimension_semantics = [#tpu.dimension_semantics<parallel>, #tpu.dimension_semantics<parallel>], iteration_bounds = array<i64: 2, 1>, scalar_prefetch = 0 : i64, scratch_operands = 2 : i64, tpu.core_type = #tpu.core_type<tc>, window_params = [{}, {pipeline_mode = #tpu.pipeline_mode<synchronous>, transform_indices = @transform_1, window_bounds = array<i64: 9, 32, 32>}, {pipeline_mode = #tpu.pipeline_mode<synchronous>, transform_indices = @transform_2, window_bounds = array<i64: 1, 32>}, {pipeline_mode = #tpu.pipeline_mode<synchronous>, transform_indices = @transform_3, window_bounds = array<i64: 1, 32>}, {pipeline_mode = #tpu.pipeline_mode<synchronous>, transform_indices = @transform_4, window_bounds = array<i64: 1, 32>}, {pipeline_mode = #tpu.pipeline_mode<synchronous>, transform_indices = @transform_5, window_bounds = array<i64: 32, 32>}, {pipeline_mode = #tpu.pipeline_mode<synchronous>, transform_indices = @transform_6, window_bounds = array<i64: 1, 32>}, {pipeline_mode = #tpu.pipeline_mode<synchronous>, transform_indices = @transform_7, window_bounds = array<i64: 1, 32>}, {pipeline_mode = #tpu.pipeline_mode<synchronous>, transform_indices = @transform_8, window_bounds = array<i64: 1, 32>}, {transform_indices = @transform_9, window_bounds = array<i64: 1, 16, 32>}]} {
    %c16_i32 = arith.constant 16 : i32
    %0 = arith.muli %arg1, %c16_i32 : i32
    %1 = tpu.assume_multiple %0, 8 : i32
    %c0_i32 = arith.constant 0 : i32
    %c0_i32_0 = arith.constant 0 : i32
    %2 = tpu.memref_slice %arg2[%arg0, %1, %c0_i32_0] : memref<2x32x32xf32, #tpu.memory_space<any>> -> memref<1x32x32xf32, #tpu.memory_space<any>>
    %3 = tpu.memref_squeeze %2 : memref<1x32x32xf32, #tpu.memory_space<any>> -> memref<32x32xf32, #tpu.memory_space<any>>
    %4 = tpu.memref_slice %arg13[%c0_i32] : memref<1x!tpu.dma_semaphore, #tpu.memory_space<semaphore_mem>> -> memref<1x!tpu.dma_semaphore, #tpu.memory_space<semaphore_mem>>
    %5 = tpu.memref_squeeze %4 : memref<1x!tpu.dma_semaphore, #tpu.memory_space<semaphore_mem>> -> memref<!tpu.dma_semaphore, #tpu.memory_space<semaphore_mem>>
    tpu.enqueue_dma source(%3 : memref<32x32xf32, #tpu.memory_space<any>>) target(%arg12 : memref<32x32xf32, #tpu.memory_space<vmem>>) target_semaphore(%5 : memref<!tpu.dma_semaphore, #tpu.memory_space<semaphore_mem>>)
    %c0_i32_1 = arith.constant 0 : i32
    %c0_i32_2 = arith.constant 0 : i32
    %6 = tpu.memref_slice %arg2[%arg0, %1, %c0_i32_2] : memref<2x32x32xf32, #tpu.memory_space<any>> -> memref<1x32x32xf32, #tpu.memory_space<any>>
    %7 = tpu.memref_squeeze %6 : memref<1x32x32xf32, #tpu.memory_space<any>> -> memref<32x32xf32, #tpu.memory_space<any>>
    %8 = tpu.memref_slice %arg13[%c0_i32_1] : memref<1x!tpu.dma_semaphore, #tpu.memory_space<semaphore_mem>> -> memref<1x!tpu.dma_semaphore, #tpu.memory_space<semaphore_mem>>
    %9 = tpu.memref_squeeze %8 : memref<1x!tpu.dma_semaphore, #tpu.memory_space<semaphore_mem>> -> memref<!tpu.dma_semaphore, #tpu.memory_space<semaphore_mem>>
    tpu.wait_dma2 semaphore(%9 : memref<!tpu.dma_semaphore, #tpu.memory_space<semaphore_mem>>) src(%7 : memref<32x32xf32, #tpu.memory_space<any>>) dst(%arg12 : memref<32x32xf32, #tpu.memory_space<vmem>>)
    %c0 = arith.constant 0 : index
    %c0_3 = arith.constant 0 : index
    %10 = vector.load %arg12[%c0, %c0_3] : memref<32x32xf32, #tpu.memory_space<vmem>>, vector<32x32xf32>
    %11 = arith.truncf %10 : vector<32x32xf32> to vector<32x32xbf16>
    %12 = vector.extract_strided_slice %10 {offsets = [8, 0], sizes = [16, 32], strides = [1, 1]} : vector<32x32xf32> to vector<16x32xf32>
    %cst = arith.constant 0.000000e+00 : f32
    %13 = vector.broadcast %cst : f32 to vector<16x32xf32>
    %14 = vector.extract_strided_slice %11 {offsets = [0, 0], sizes = [16, 32], strides = [1, 1]} : vector<32x32xbf16> to vector<16x32xbf16>
    %c0_4 = arith.constant 0 : index
    %c0_5 = arith.constant 0 : index
    %c0_6 = arith.constant 0 : index
    %15 = vector.load %arg3[%c0_4, %c0_5, %c0_6] : memref<9x32x32xbf16, #tpu.memory_space<vmem>>, vector<1x32x32xbf16>
    %16 = vector.shape_cast %15 : vector<1x32x32xbf16> to vector<32x32xbf16>
    %cst_7 = arith.constant dense<0.000000e+00> : vector<16x32xf32>
    %17 = tpu.matmul %14, %16, %cst_7 {dimension_numbers = #tpu.dot_dimension_numbers<[1], [0], [0], [1], [0, 0, 1, 1], [], []>} : vector<16x32xbf16>, vector<32x32xbf16>, vector<16x32xf32> -> vector<16x32xf32>
    %18 = arith.addf %13, %17 : vector<16x32xf32>
    %19 = vector.extract_strided_slice %11 {offsets = [2, 0], sizes = [16, 32], strides = [1, 1]} : vector<32x32xbf16> to vector<16x32xbf16>
    %c1 = arith.constant 1 : index
    %c0_8 = arith.constant 0 : index
    %c0_9 = arith.constant 0 : index
    %20 = vector.load %arg3[%c1, %c0_8, %c0_9] : memref<9x32x32xbf16, #tpu.memory_space<vmem>>, vector<1x32x32xbf16>
    %21 = vector.shape_cast %20 : vector<1x32x32xbf16> to vector<32x32xbf16>
    %cst_10 = arith.constant dense<0.000000e+00> : vector<16x32xf32>
    %22 = tpu.matmul %19, %21, %cst_10 {dimension_numbers = #tpu.dot_dimension_numbers<[1], [0], [0], [1], [0, 0, 1, 1], [], []>} : vector<16x32xbf16>, vector<32x32xbf16>, vector<16x32xf32> -> vector<16x32xf32>
    %23 = arith.addf %18, %22 : vector<16x32xf32>
    %24 = vector.extract_strided_slice %11 {offsets = [4, 0], sizes = [16, 32], strides = [1, 1]} : vector<32x32xbf16> to vector<16x32xbf16>
    %c2 = arith.constant 2 : index
    %c0_11 = arith.constant 0 : index
    %c0_12 = arith.constant 0 : index
    %25 = vector.load %arg3[%c2, %c0_11, %c0_12] : memref<9x32x32xbf16, #tpu.memory_space<vmem>>, vector<1x32x32xbf16>
    %26 = vector.shape_cast %25 : vector<1x32x32xbf16> to vector<32x32xbf16>
    %cst_13 = arith.constant dense<0.000000e+00> : vector<16x32xf32>
    %27 = tpu.matmul %24, %26, %cst_13 {dimension_numbers = #tpu.dot_dimension_numbers<[1], [0], [0], [1], [0, 0, 1, 1], [], []>} : vector<16x32xbf16>, vector<32x32xbf16>, vector<16x32xf32> -> vector<16x32xf32>
    %28 = arith.addf %23, %27 : vector<16x32xf32>
    %29 = vector.extract_strided_slice %11 {offsets = [6, 0], sizes = [16, 32], strides = [1, 1]} : vector<32x32xbf16> to vector<16x32xbf16>
    %c3 = arith.constant 3 : index
    %c0_14 = arith.constant 0 : index
    %c0_15 = arith.constant 0 : index
    %30 = vector.load %arg3[%c3, %c0_14, %c0_15] : memref<9x32x32xbf16, #tpu.memory_space<vmem>>, vector<1x32x32xbf16>
    %31 = vector.shape_cast %30 : vector<1x32x32xbf16> to vector<32x32xbf16>
    %cst_16 = arith.constant dense<0.000000e+00> : vector<16x32xf32>
    %32 = tpu.matmul %29, %31, %cst_16 {dimension_numbers = #tpu.dot_dimension_numbers<[1], [0], [0], [1], [0, 0, 1, 1], [], []>} : vector<16x32xbf16>, vector<32x32xbf16>, vector<16x32xf32> -> vector<16x32xf32>
    %33 = arith.addf %28, %32 : vector<16x32xf32>
    %34 = vector.extract_strided_slice %11 {offsets = [8, 0], sizes = [16, 32], strides = [1, 1]} : vector<32x32xbf16> to vector<16x32xbf16>
    %c4 = arith.constant 4 : index
    %c0_17 = arith.constant 0 : index
    %c0_18 = arith.constant 0 : index
    %35 = vector.load %arg3[%c4, %c0_17, %c0_18] : memref<9x32x32xbf16, #tpu.memory_space<vmem>>, vector<1x32x32xbf16>
    %36 = vector.shape_cast %35 : vector<1x32x32xbf16> to vector<32x32xbf16>
    %cst_19 = arith.constant dense<0.000000e+00> : vector<16x32xf32>
    %37 = tpu.matmul %34, %36, %cst_19 {dimension_numbers = #tpu.dot_dimension_numbers<[1], [0], [0], [1], [0, 0, 1, 1], [], []>} : vector<16x32xbf16>, vector<32x32xbf16>, vector<16x32xf32> -> vector<16x32xf32>
    %38 = arith.addf %33, %37 : vector<16x32xf32>
    %39 = vector.extract_strided_slice %11 {offsets = [10, 0], sizes = [16, 32], strides = [1, 1]} : vector<32x32xbf16> to vector<16x32xbf16>
    %c5 = arith.constant 5 : index
    %c0_20 = arith.constant 0 : index
    %c0_21 = arith.constant 0 : index
    %40 = vector.load %arg3[%c5, %c0_20, %c0_21] : memref<9x32x32xbf16, #tpu.memory_space<vmem>>, vector<1x32x32xbf16>
    %41 = vector.shape_cast %40 : vector<1x32x32xbf16> to vector<32x32xbf16>
    %cst_22 = arith.constant dense<0.000000e+00> : vector<16x32xf32>
    %42 = tpu.matmul %39, %41, %cst_22 {dimension_numbers = #tpu.dot_dimension_numbers<[1], [0], [0], [1], [0, 0, 1, 1], [], []>} : vector<16x32xbf16>, vector<32x32xbf16>, vector<16x32xf32> -> vector<16x32xf32>
    %43 = arith.addf %38, %42 : vector<16x32xf32>
    %44 = vector.extract_strided_slice %11 {offsets = [12, 0], sizes = [16, 32], strides = [1, 1]} : vector<32x32xbf16> to vector<16x32xbf16>
    %c6 = arith.constant 6 : index
    %c0_23 = arith.constant 0 : index
    %c0_24 = arith.constant 0 : index
    %45 = vector.load %arg3[%c6, %c0_23, %c0_24] : memref<9x32x32xbf16, #tpu.memory_space<vmem>>, vector<1x32x32xbf16>
    %46 = vector.shape_cast %45 : vector<1x32x32xbf16> to vector<32x32xbf16>
    %cst_25 = arith.constant dense<0.000000e+00> : vector<16x32xf32>
    %47 = tpu.matmul %44, %46, %cst_25 {dimension_numbers = #tpu.dot_dimension_numbers<[1], [0], [0], [1], [0, 0, 1, 1], [], []>} : vector<16x32xbf16>, vector<32x32xbf16>, vector<16x32xf32> -> vector<16x32xf32>
    %48 = arith.addf %43, %47 : vector<16x32xf32>
    %49 = vector.extract_strided_slice %11 {offsets = [14, 0], sizes = [16, 32], strides = [1, 1]} : vector<32x32xbf16> to vector<16x32xbf16>
    %c7 = arith.constant 7 : index
    %c0_26 = arith.constant 0 : index
    %c0_27 = arith.constant 0 : index
    %50 = vector.load %arg3[%c7, %c0_26, %c0_27] : memref<9x32x32xbf16, #tpu.memory_space<vmem>>, vector<1x32x32xbf16>
    %51 = vector.shape_cast %50 : vector<1x32x32xbf16> to vector<32x32xbf16>
    %cst_28 = arith.constant dense<0.000000e+00> : vector<16x32xf32>
    %52 = tpu.matmul %49, %51, %cst_28 {dimension_numbers = #tpu.dot_dimension_numbers<[1], [0], [0], [1], [0, 0, 1, 1], [], []>} : vector<16x32xbf16>, vector<32x32xbf16>, vector<16x32xf32> -> vector<16x32xf32>
    %53 = arith.addf %48, %52 : vector<16x32xf32>
    %54 = vector.extract_strided_slice %11 {offsets = [16, 0], sizes = [16, 32], strides = [1, 1]} : vector<32x32xbf16> to vector<16x32xbf16>
    %c8 = arith.constant 8 : index
    %c0_29 = arith.constant 0 : index
    %c0_30 = arith.constant 0 : index
    %55 = vector.load %arg3[%c8, %c0_29, %c0_30] : memref<9x32x32xbf16, #tpu.memory_space<vmem>>, vector<1x32x32xbf16>
    %56 = vector.shape_cast %55 : vector<1x32x32xbf16> to vector<32x32xbf16>
    %cst_31 = arith.constant dense<0.000000e+00> : vector<16x32xf32>
    %57 = tpu.matmul %54, %56, %cst_31 {dimension_numbers = #tpu.dot_dimension_numbers<[1], [0], [0], [1], [0, 0, 1, 1], [], []>} : vector<16x32xbf16>, vector<32x32xbf16>, vector<16x32xf32> -> vector<16x32xf32>
    %58 = arith.addf %53, %57 : vector<16x32xf32>
    %c0_32 = arith.constant 0 : index
    %c0_33 = arith.constant 0 : index
    %59 = vector.load %arg4[%c0_32, %c0_33] : memref<1x32xf32, #tpu.memory_space<vmem>>, vector<1x32xf32>
    %60 = vector.broadcast %59 : vector<1x32xf32> to vector<16x32xf32>
    %61 = arith.addf %58, %60 : vector<16x32xf32>
    %cst_34 = arith.constant 5.000000e-01 : f32
    %62 = vector.broadcast %cst_34 : f32 to vector<16x32xf32>
    %63 = arith.mulf %62, %61 : vector<16x32xf32>
    %cst_35 = arith.constant 0.707106769 : f32
    %64 = vector.broadcast %cst_35 : f32 to vector<16x32xf32>
    %65 = arith.mulf %61, %64 : vector<16x32xf32>
    %66 = math.erf %65 : vector<16x32xf32>
    %cst_36 = arith.constant 1.000000e+00 : f32
    %67 = vector.broadcast %cst_36 : f32 to vector<16x32xf32>
    %68 = arith.addf %67, %66 : vector<16x32xf32>
    %69 = arith.mulf %63, %68 : vector<16x32xf32>
    %c0_37 = arith.constant 0 : index
    %c0_38 = arith.constant 0 : index
    %70 = vector.load %arg5[%c0_37, %c0_38] : memref<1x32xf32, #tpu.memory_space<vmem>>, vector<1x32xf32>
    %c0_39 = arith.constant 0 : index
    %c0_40 = arith.constant 0 : index
    %71 = vector.load %arg6[%c0_39, %c0_40] : memref<1x32xf32, #tpu.memory_space<vmem>>, vector<1x32xf32>
    %cst_41 = arith.constant dense<0.000000e+00> : vector<16xf32>
    %72 = vector.multi_reduction <add>, %69, %cst_41 [1] : vector<16x32xf32> to vector<16xf32>
    %73 = vector.shape_cast %72 : vector<16xf32> to vector<16x1xf32>
    %cst_42 = arith.constant 3.200000e+01 : f32
    %74 = vector.broadcast %cst_42 : f32 to vector<16x1xf32>
    %75 = arith.divf %73, %74 : vector<16x1xf32>
    %76 = vector.broadcast %75 : vector<16x1xf32> to vector<16x32xf32>
    %77 = arith.subf %69, %76 : vector<16x32xf32>
    %78 = arith.mulf %77, %77 : vector<16x32xf32>
    %cst_43 = arith.constant dense<0.000000e+00> : vector<16xf32>
    %79 = vector.multi_reduction <add>, %78, %cst_43 [1] : vector<16x32xf32> to vector<16xf32>
    %80 = vector.shape_cast %79 : vector<16xf32> to vector<16x1xf32>
    %cst_44 = arith.constant 3.200000e+01 : f32
    %81 = vector.broadcast %cst_44 : f32 to vector<16x1xf32>
    %82 = arith.divf %80, %81 : vector<16x1xf32>
    %cst_45 = arith.constant 9.99999974E-6 : f32
    %83 = vector.broadcast %cst_45 : f32 to vector<16x1xf32>
    %84 = arith.addf %82, %83 : vector<16x1xf32>
    %85 = math.rsqrt %84 : vector<16x1xf32>
    %86 = vector.broadcast %75 : vector<16x1xf32> to vector<16x32xf32>
    %87 = arith.subf %69, %86 : vector<16x32xf32>
    %88 = vector.broadcast %85 : vector<16x1xf32> to vector<16x32xf32>
    %89 = arith.mulf %87, %88 : vector<16x32xf32>
    %90 = vector.broadcast %70 : vector<1x32xf32> to vector<16x32xf32>
    %91 = arith.mulf %89, %90 : vector<16x32xf32>
    %92 = vector.broadcast %71 : vector<1x32xf32> to vector<16x32xf32>
    %93 = arith.addf %91, %92 : vector<16x32xf32>
    %94 = arith.addf %12, %93 : vector<16x32xf32>
    %95 = arith.truncf %94 : vector<16x32xf32> to vector<16x32xbf16>
    %c0_46 = arith.constant 0 : index
    %c0_47 = arith.constant 0 : index
    %96 = vector.load %arg7[%c0_46, %c0_47] : memref<32x32xbf16, #tpu.memory_space<vmem>>, vector<32x32xbf16>
    %cst_48 = arith.constant dense<0.000000e+00> : vector<16x32xf32>
    %97 = tpu.matmul %95, %96, %cst_48 {dimension_numbers = #tpu.dot_dimension_numbers<[1], [0], [0], [1], [0, 0, 1, 1], [], []>} : vector<16x32xbf16>, vector<32x32xbf16>, vector<16x32xf32> -> vector<16x32xf32>
    %c0_49 = arith.constant 0 : index
    %c0_50 = arith.constant 0 : index
    %98 = vector.load %arg8[%c0_49, %c0_50] : memref<1x32xf32, #tpu.memory_space<vmem>>, vector<1x32xf32>
    %99 = vector.broadcast %98 : vector<1x32xf32> to vector<16x32xf32>
    %100 = arith.addf %97, %99 : vector<16x32xf32>
    %cst_51 = arith.constant 5.000000e-01 : f32
    %101 = vector.broadcast %cst_51 : f32 to vector<16x32xf32>
    %102 = arith.mulf %101, %100 : vector<16x32xf32>
    %cst_52 = arith.constant 0.707106769 : f32
    %103 = vector.broadcast %cst_52 : f32 to vector<16x32xf32>
    %104 = arith.mulf %100, %103 : vector<16x32xf32>
    %105 = math.erf %104 : vector<16x32xf32>
    %cst_53 = arith.constant 1.000000e+00 : f32
    %106 = vector.broadcast %cst_53 : f32 to vector<16x32xf32>
    %107 = arith.addf %106, %105 : vector<16x32xf32>
    %108 = arith.mulf %102, %107 : vector<16x32xf32>
    %c0_54 = arith.constant 0 : index
    %c0_55 = arith.constant 0 : index
    %109 = vector.load %arg9[%c0_54, %c0_55] : memref<1x32xf32, #tpu.memory_space<vmem>>, vector<1x32xf32>
    %c0_56 = arith.constant 0 : index
    %c0_57 = arith.constant 0 : index
    %110 = vector.load %arg10[%c0_56, %c0_57] : memref<1x32xf32, #tpu.memory_space<vmem>>, vector<1x32xf32>
    %cst_58 = arith.constant dense<0.000000e+00> : vector<16xf32>
    %111 = vector.multi_reduction <add>, %108, %cst_58 [1] : vector<16x32xf32> to vector<16xf32>
    %112 = vector.shape_cast %111 : vector<16xf32> to vector<16x1xf32>
    %cst_59 = arith.constant 3.200000e+01 : f32
    %113 = vector.broadcast %cst_59 : f32 to vector<16x1xf32>
    %114 = arith.divf %112, %113 : vector<16x1xf32>
    %115 = vector.broadcast %114 : vector<16x1xf32> to vector<16x32xf32>
    %116 = arith.subf %108, %115 : vector<16x32xf32>
    %117 = arith.mulf %116, %116 : vector<16x32xf32>
    %cst_60 = arith.constant dense<0.000000e+00> : vector<16xf32>
    %118 = vector.multi_reduction <add>, %117, %cst_60 [1] : vector<16x32xf32> to vector<16xf32>
    %119 = vector.shape_cast %118 : vector<16xf32> to vector<16x1xf32>
    %cst_61 = arith.constant 3.200000e+01 : f32
    %120 = vector.broadcast %cst_61 : f32 to vector<16x1xf32>
    %121 = arith.divf %119, %120 : vector<16x1xf32>
    %cst_62 = arith.constant 9.99999974E-6 : f32
    %122 = vector.broadcast %cst_62 : f32 to vector<16x1xf32>
    %123 = arith.addf %121, %122 : vector<16x1xf32>
    %124 = math.rsqrt %123 : vector<16x1xf32>
    %125 = vector.broadcast %114 : vector<16x1xf32> to vector<16x32xf32>
    %126 = arith.subf %108, %125 : vector<16x32xf32>
    %127 = vector.broadcast %124 : vector<16x1xf32> to vector<16x32xf32>
    %128 = arith.mulf %126, %127 : vector<16x32xf32>
    %129 = vector.broadcast %109 : vector<1x32xf32> to vector<16x32xf32>
    %130 = arith.mulf %128, %129 : vector<16x32xf32>
    %131 = vector.broadcast %110 : vector<1x32xf32> to vector<16x32xf32>
    %132 = arith.addf %130, %131 : vector<16x32xf32>
    %133 = arith.addf %94, %132 : vector<16x32xf32>
    %c0_63 = arith.constant 0 : index
    %c0_64 = arith.constant 0 : index
    %c0_65 = arith.constant 0 : index
    %134 = vector.load %arg11[%c0_63, %c0_64, %c0_65] : memref<1x16x32xf32, #tpu.memory_space<vmem>>, vector<1x16x32xf32>
    %135 = vector.shape_cast %134 : vector<1x16x32xf32> to vector<16x32xf32>
    %136 = vector.shape_cast %133 : vector<16x32xf32> to vector<1x16x32xf32>
    tpu.vector_store %arg11[%c0_63, %c0_64, %c0_65], %136 {strides = array<i32>} : memref<1x16x32xf32, #tpu.memory_space<vmem>>, vector<1x16x32xf32>,
    return
  }
  func.func @transform_1(%arg0: i32, %arg1: i32) -> (i32, i32, i32) {
    %c0_i32 = arith.constant 0 : i32
    %c0_i32_0 = arith.constant 0 : i32
    %c0_i32_1 = arith.constant 0 : i32
    %c0_i32_2 = arith.constant 0 : i32
    return %c0_i32, %c0_i32_0, %c0_i32_1 : i32, i32, i32
  }
  func.func @transform_2(%arg0: i32, %arg1: i32) -> (i32, i32) {
    %c0_i32 = arith.constant 0 : i32
    %c0_i32_0 = arith.constant 0 : i32
    %c0_i32_1 = arith.constant 0 : i32
    return %c0_i32, %c0_i32_0 : i32, i32
  }
  func.func @transform_3(%arg0: i32, %arg1: i32) -> (i32, i32) {
    %c0_i32 = arith.constant 0 : i32
    %c0_i32_0 = arith.constant 0 : i32
    %c0_i32_1 = arith.constant 0 : i32
    return %c0_i32, %c0_i32_0 : i32, i32
  }
  func.func @transform_4(%arg0: i32, %arg1: i32) -> (i32, i32) {
    %c0_i32 = arith.constant 0 : i32
    %c0_i32_0 = arith.constant 0 : i32
    %c0_i32_1 = arith.constant 0 : i32
    return %c0_i32, %c0_i32_0 : i32, i32
  }
  func.func @transform_5(%arg0: i32, %arg1: i32) -> (i32, i32) {
    %c0_i32 = arith.constant 0 : i32
    %c0_i32_0 = arith.constant 0 : i32
    %c0_i32_1 = arith.constant 0 : i32
    return %c0_i32, %c0_i32_0 : i32, i32
  }
  func.func @transform_6(%arg0: i32, %arg1: i32) -> (i32, i32) {
    %c0_i32 = arith.constant 0 : i32
    %c0_i32_0 = arith.constant 0 : i32
    %c0_i32_1 = arith.constant 0 : i32
    return %c0_i32, %c0_i32_0 : i32, i32
  }
  func.func @transform_7(%arg0: i32, %arg1: i32) -> (i32, i32) {
    %c0_i32 = arith.constant 0 : i32
    %c0_i32_0 = arith.constant 0 : i32
    %c0_i32_1 = arith.constant 0 : i32
    return %c0_i32, %c0_i32_0 : i32, i32
  }
  func.func @transform_8(%arg0: i32, %arg1: i32) -> (i32, i32) {
    %c0_i32 = arith.constant 0 : i32
    %c0_i32_0 = arith.constant 0 : i32
    %c0_i32_1 = arith.constant 0 : i32
    return %c0_i32, %c0_i32_0 : i32, i32
  }
  func.func @transform_9(%arg0: i32, %arg1: i32) -> (i32, i32, i32) {
    %c0_i32 = arith.constant 0 : i32
    %c0_i32_0 = arith.constant 0 : i32
    return %arg0, %arg1, %c0_i32 : i32, i32, i32
  }
}

</mosaic_0001>

<bundles_post_ra>
// kernel: tpu_custom_call.1
= control target key start
LH: loop header
LB: loop body
LE: loop exit
PB: predicated region body
PF: predicated region fallthrough
CT: control target
= control target key end

     0   :  { %s2036_s0 = inlined_call_operand.hbm [shape: f32[2,32,32], index: 0, kind: input, shape index: {}]   ;;  %s2037_s1 = inlined_call_operand.hbm [shape: bf16[9,32,32], index: 1, kind: input, shape index: {}]   ;;  %s2038_s2 = inlined_call_operand.vmem [shape: f32[1,32], index: 2, kind: input, shape index: {}]   ;;  %s2039_s3 = inlined_call_operand.vmem [shape: f32[1,32], index: 3, kind: input, shape index: {}]   ;;  %s2040_s4 = inlined_call_operand.vmem [shape: f32[1,32], index: 4, kind: input, shape index: {}]   ;;  %s2041_s5 = inlined_call_operand.hbm [shape: bf16[32,32], index: 5, kind: input, shape index: {}]   ;;  %s2042_s6 = inlined_call_operand.vmem [shape: f32[1,32], index: 6, kind: input, shape index: {}]   ;;  %s2043_s7 = inlined_call_operand.vmem [shape: f32[1,32], index: 7, kind: input, shape index: {}]   ;;  %s2044_s8 = inlined_call_operand.vmem [shape: f32[1,32], index: 8, kind: input, shape index: {}]   ;;  %s2045_s9 = inlined_call_operand.hbm [shape: f32[2,16,32], index: 9, kind: output, shape index: {}]  }
   0x1   :  { %2049 = sst [smem:[#allocation19_spill]] %s2037_s1 }
   0x2   :  { %2050 = sst [smem:[#allocation20_spill]] %s2041_s5 }
   0x3   :  { %14 = vsyncpa [#allocation5], 0 }
   0x4   :  { %15 = vsyncpa [#allocation8], 0 }
   0x5   :  { %16 = vsyncpa [#allocation6], 0 }
   0x6   :  { %18 = vsyncpa [#allocation6 + $0x1], 0  ;;  %s1757_s30 = smov 0   ;;  %s1759_s10 = smov 0  }
   0x7   :  { %s1761_s11 = smov 0   ;;  %s1763_s12 = smov 0  }
   0x8   :  { %s1765_s13 = smov 0   ;;  %s1767_s14 = smov 0  }
   0x9 LB: > { %s1251_s15 = sadd.s32 4294967295, %s1695_s14   ;;  %s1252_s16 = sadd.s32 4294967294, %s1695_s14   ;;  %s1695_s14 = sphi %s1767_s14, %s24_s14   ;;  %s1691_s13 = sphi %s1765_s13, %s2067_s13   ;;  %s1687_s12 = sphi %s1763_s12, %s2066_s12   ;;  %s1683_s11 = sphi %s1761_s11, %s2065_s11   ;;  %s1679_s10 = sphi %s1759_s10, %s2064_s10   ;;  %s1675_s30 = sphi %s1757_s30, %s2063_s30  }
   0xa   : > { %s36_s17 = sadd.s32 1, %s1691_s13  ;;  %s213_s18 = sadd.s32 1, %s1683_s11 }
   0xb   : > { %p38_p0 = scmp.ge.s32.totalorder %s36_s17, 2  ;;  %p223_p1 = scmp.ne.s32.totalorder %s1683_s11, %s1679_s10 }
   0xc   : > { %p224_p2 = scmp.eq.s32.totalorder %s1251_s15, 1  ;;  %p229_p3 = scmp.ne.s32.totalorder %s1679_s10, %s1675_s30 }
   0xd   : > { %s2069_s17 = smov (%p38_p0, %s36_s17), 0  ;;  %p230_p5 = scmp.eq.s32.totalorder %s1252_s16, 1 }
   0xe   : > { %2051 = sst [smem:[#allocation18_spill]] %s2069_s17  ;;  %p1797_p4 = por %p224_p2, %p223_p1 }
   0xf   : > { %s208_s20 = ssub.s32 %s1691_s13, %s2069_s17  ;;  %p1253_p6 = scmp.ge.s32.totalorder %s1695_s14, 1 }
  0x10   : > { %s2052_s19 = scalar_select %p1797_p4, 1, 0 }
  0x11   : > { %p211_p7 = scmp.eq.s32.totalorder %s208_s20, 0  ;;  %p1804_p8 = por %p230_p5, %p229_p3 }
  0x12   : > { %p237_p9 = scmp.lt.s32.totalorder %s1695_s14, 3  ;;  %p1816_p11 = scmp.eq.s32.totalorder %s1251_s15, 0 }
  0x13   : > { %s2053_s21 = scalar_select %p1804_p8, 1, 0 }
  0x14   : > { %s1810_s22 = scalar_select %p211_p7, %s1683_s11, %s213_s18  }
  0x15   : > { %p1812_p10 = pnand %p1253_p6, %p237_p9  ;;  %s1697_s25 = smov [#allocation4]  }
  0x16   : > { %s249_s26 = sshll.u32 %s1697_s25, 4  ;;  %s1698_s28 = smov [#allocation7]   ;;  %s250_s26 = int_to_ptr.vmem [resolvable:$true] %s249_s26 }
  0x17   : > { %p1426_p12 = pneg %p1812_p10  ;;  %s271_s29 = sshll.u32 %s1698_s28, 4  ;;  %s272_s29 = int_to_ptr.vmem [resolvable:$true] %s271_s29 }
  0x18   : > { %s1546_s15 = scalar_lea.vmem %s250_s26, 2304  ;;  %p1554_p5 = scmp.lt.s32.totalorder %s250_s26, %s250_s26 }
  0x19   : > { %p1824_p13 = pnand %p1816_p11, %p1426_p12  ;;  %p1547_p1 = scmp.ne.s32.totalorder %s250_s26, %s1546_s15 }
  0x1a   : > { %p1555_p6 = scmp.lt.s32.totalorder %s1546_s15, %s1546_s15 }
  0x1b   : > { %p1537_p0 = pneg %p1824_p13 }
  0x1c   : > { %p1556_p7 = por %p1555_p6, %p1554_p5 }
  0x1d   : > { %p1549_p2 = pnand %p1547_p1, %p1537_p0 }
  0x1f   : > { %p1550_p3 = pneg %p1549_p2 }
  0x21   : > { %p1557_p9 = pnand %p1556_p7, %p1550_p3 }
  0x23   : > { %1560 = shalt.err (!%p1557_p9)
}
  0x24   : > { %s1699_s16 = smov 64   ;;  %s1700_s18 = smov 4  }
  0x25   : > { %s2057_s1 = sld [smem:[#allocation19_spill]]  ;;  %s1572_s28 = scalar_lea.vmem %s272_s29, 256 }
  0x26   : > { %p1573_p12 = scmp.ne.s32.totalorder %s272_s29, %s1572_s28  ;;  %p1580_p8 = scmp.lt.s32.totalorder %s272_s29, %s272_s29 }
  0x27   : > { %p1581_p4 = scmp.lt.s32.totalorder %s1572_s28, %s1572_s28 }
  0x28   : > { %p1575_p1 = pnand %p1573_p12, %p1537_p0 }
  0x29   : > { %p1582_p5 = por %p1581_p4, %p1580_p8 }
  0x2a   : > { %p1576_p2 = pneg %p1575_p1 }
  0x2b   : > { %1429 = dma.hbm_to_vmem [thread:$0]  (!%p1824_p13), %s2057_s1, 2304, %s250_s26, [#allocation5], %s1699_s16, %s1699_s16, %s1700_s18  }
  0x2c   : > { %p1583_p3 = pnand %p1582_p5, %p1576_p2 }
  0x2e   : > { %1586 = shalt.err (!%p1583_p3)
}
  0x2f   : > { %s2058_s5 = sld [smem:[#allocation20_spill]] }
  0x31   : > { %296 = sbr.rel (%p1812_p10) target bundleno = 1198 (0x4ae), region = 52 }
  0x35   : > { %1432 = dma.hbm_to_vmem [thread:$0]  (!%p1824_p13), %s2058_s5, 256, %s272_s29, [#allocation8], %s1699_s16, %s1699_s16, %s1700_s18  }
  0x36   : > { %1660 = dma.done.wait (%p1816_p11), [#allocation5], 2304  }
  0x37   : > { %1662 = vsyncadd (%p1816_p11), [#allocation5], 4294964992 }
  0x38   : > { %1664 = dma.done.wait (%p1816_p11), [#allocation8], 256  }
  0x39   : > { %1666 = vsyncadd (%p1816_p11), [#allocation8], 4294967040  ;;  %s2048_s17 = sand.u32 1, %s1679_s10   ;;  %s1304_s26 = sshll.u32 %s1687_s12, 9 }
  0x3a   : > { %s1259_s23 = sshll.u32 %s2048_s17, 4  ;;  %s335_s16 = scalar_lea.hbm %s2036_s0, %s1304_s26 }
  0x3b   : > { %s1701_s18 = smov [#allocation2]   ;;  %s1587_s25 = scalar_lea.hbm %s335_s16, 512 }
  0x3c   : > { %s343_s20 = sshll.u32 %s1701_s18, 4  ;;  %p1588_p4 = scmp.ne.s32.totalorder %s335_s16, %s1587_s25  ;;  %s344_s20 = int_to_ptr.vmem [resolvable:$true] %s343_s20 }
  0x3d   : > { %s1589_s24 = scalar_lea.hbm %s2036_s0, 1024  ;;  %p1590_p8 = scmp.lt.s32.totalorder %s335_s16, %s2036_s0 }
  0x3e   : > { %p1591_p10 = scmp.lt.s32.totalorder %s1589_s24, %s1587_s25 }
  0x40   : > { %p1592_p11 = por %p1591_p10, %p1590_p8 }
  0x42   : > { %p1593_p13 = pnand %p1592_p11, %p1588_p4 }
  0x44   : > { %1596 = shalt.err (!%p1593_p13)  }
  0x45   : > { %s1597_s17 = scalar_lea.vmem %s344_s20, 512  ;;  %p1602_p6 = scmp.lt.s32.totalorder %s344_s20, %s344_s20 }
  0x46   : > { %p1598_p0 = scmp.ne.s32.totalorder %s344_s20, %s1597_s17  ;;  %p1603_p7 = scmp.lt.s32.totalorder %s1597_s17, %s1597_s17 }
  0x48   : > { %p1604_p9 = por %p1603_p7, %p1602_p6 }
  0x4a   : > { %p1605_p12 = pnand %p1604_p9, %p1598_p0 }
  0x4c   : > { %1608 = shalt.err (!%p1605_p12)  }
  0x4d   : > { %346 = dma.hbm_to_vmem [thread:$0]  %s335_s16, 512, %s344_s20, [#allocation3] }
  0x4e   : > { %s1869_s26 = scalar_lea.vmem [#allocation9], %s1259_s23 }
  0x4f   : > { %1667 = dma.done.wait [#allocation3], 512 }
  0x50   : > { %1668 = vsyncadd [#allocation3], 4294966784  ;;  %v1702_v0 = vmov 0.0   ;;  %vm1703_vm0 = vmmov 0   ;;  %v1499_v1 = vld [vmem:[#allocation4 + $0x18] sm:$0xff]   ;;  %v1500_v2 = vld [vmem:[#allocation4 + $0x8] sm:$0xff]  }
  0x51   : > { %1336 = vmatprep.subr.bf16.mxu0 %v1702_v0  ;;  %1344 = vmatprep.subr.bf16.mxu1 %v1702_v0  ;;  %v1501_v3 = vld [vmem:[#allocation4 + $0x10] sm:$0xff]   ;;  %v1502_v4 = vld [vmem:[#allocation4] sm:$0xff]   ;;  %v1879_v6 = vld [vmem:[#allocation2 + $0x8] sm:$0xff]  ;;  %vm367_vm1 = vcmask 1046528   ;;  %vm383_vm2 = vcmask 261120   ;;  %vm556_vm3 = vcmask 1044480  }
  0x52   : > { %1340 = vmatprep.mubr.msk.bf16.mxu0 %vm1703_vm0, %v1702_v0  ;;  %1348 = vmatprep.mubr.msk.bf16.mxu1 %vm1703_vm0, %v1702_v0  ;;  %v350_v5 = vld [vmem:[#allocation2] sm:$0xff]  ;;  %v1881_v7 = vld [vmem:[#allocation2 + $0x10] sm:$0xff]  ;;  %v353_v8 = vld [vmem:[#allocation2 + $0x18] sm:$0xff]  ;;  %vm489_vm4 = vcmask 1045504   ;;  %vm690_vm5 = vcmask 1042432   ;;  %vm623_vm6 = vcmask 1043456  }
  0x53   : > { %1337 = vmatpush3.bf16.msra.mxu0 %v1499_v1  ;;  %1345 = vmatpush3.bf16.msra.mxu1 %v1500_v2  ;;  %v1884_v9 = vpack.c.bf16 %v1879_v6, %v350_v5  ;;  %v1887_v10 = vpack.c.bf16 %v353_v8, %v1881_v7  ;;  %v1504_v12 = vld [vmem:[#allocation4 + $0x38] sm:$0xff]   ;;  %v1503_v14 = vld [vmem:[#allocation4 + $0x28] sm:$0xff]   ;;  %v1506_v15 = vld [vmem:[#allocation4 + $0x30] sm:$0xff]   ;;  %vm824_vm7 = vcmask 1040384   ;;  %vm757_vm8 = vcmask 1041408   ;;  %s1305_s24 = sshll.u32 %s1687_s12, 8 }
  0x54   : > { %1338 = vmatprep.subr.bf16.mxu0 %v1702_v0  ;;  %1346 = vmatprep.subr.bf16.mxu1 %v1702_v0  ;;  %v1505_v17 = vld [vmem:[#allocation4 + $0x20] sm:$0xff]   ;;  %v1508_v23 = vld [vmem:[#allocation4 + $0x58] sm:$0xff]   ;;  %v1507_v25 = vld [vmem:[#allocation4 + $0x48] sm:$0xff]   ;;  %s1157_s1 = sshll.u32 %s1869_s26, 4  ;;  %s1983_s23 = scalar_lea.hbm %s2045_s9, %s1305_s24  ;;  %s1985_s1 = int_to_ptr.vmem [resolvable:$true] %s1157_s1 }
  0x55   : > { %v368_v11 = vrot.slane %v1884_v9, 1  ;;  %v369_v13 = vrot.slane %v1887_v10, 1  ;;  %v557_v18 = vrot.slane %v1884_v9, 3  ;;  %v558_v19 = vrot.slane %v1887_v10, 3  ;;  %v1510_v26 = vld [vmem:[#allocation4 + $0x50] sm:$0xff]   ;;  %v1509_v29 = vld [vmem:[#allocation4 + $0x40] sm:$0xff]  }
  0x56   : > { %v490_v20 = vrot.slane %v1884_v9, 2  ;;  %v491_v21 = vrot.slane %v1887_v10, 2  ;;  %v624_v27 = vrot.slane %v1884_v9, 4  ;;  %v625_v28 = vrot.slane %v1887_v10, 4  ;;  %v1512_v33 = vld [vmem:[#allocation4 + $0x78] sm:$0xff]   ;;  %v1511_v35 = vld [vmem:[#allocation4 + $0x68] sm:$0xff]  }
  0x57   : > { %1339 = vmatpush3.bf16.msra.mxu0 %v1501_v3  ;;  %1347 = vmatpush3.bf16.msra.mxu1 %v1502_v4  ;;  %v370_v16 = vsel %vm367_vm1, %v368_v11, %v369_v13  ;;  %v559_v22 = vsel %vm556_vm3, %v557_v18, %v558_v19  ;;  %v691_v30 = vrot.slane %v1884_v9, 5  ;;  %v692_v31 = vrot.slane %v1887_v10, 5  ;;  %v1514_v36 = vld [vmem:[#allocation4 + $0x70] sm:$0xff]   ;;  %v1513_v39 = vld [vmem:[#allocation4 + $0x60] sm:$0xff]   ;;  %v1515_v44 = vld [vmem:[#allocation4 + $0x88] sm:$0xff]   ;;  %s2059_s27 = sand.u32 1, %s1679_s10  }
  0x58   : > { %1352 = vmatprep.subr.bf16.mxu0 %v1702_v0  ;;  %1360 = vmatprep.subr.bf16.mxu1 %v1702_v0  ;;  %v492_v24 = vsel %vm489_vm4, %v490_v20, %v491_v21  ;;  %v626_v34 = vsel %vm623_vm6, %v624_v27, %v625_v28  ;;  %v825_v37 = vrot.slane %v1884_v9, 7  ;;  %v826_v38 = vrot.slane %v1887_v10, 7  ;;  %v1516_v45 = vld [vmem:[#allocation4 + $0x80] sm:$0xff]   ;;  %s1991_s29 = scalar_lea.sflag [#allocation6], %s2059_s27  ;;  %s1609_s12 = scalar_lea.vmem %s1985_s1, 256 }
  0x59   : > { %v693_v32 = vsel %vm690_vm5, %v691_v30, %v692_v31  ;;  %v758_v40 = vrot.slane %v1884_v9, 6  ;;  %v759_v41 = vrot.slane %v1887_v10, 6  ;;  %v1289_v31 = vld [vmem:[%s2038_s2] ss:$0 sm:$0xff]  ;;  %p1610_p1 = scmp.ne.s32.totalorder %s1985_s1, %s1609_s12  ;;  %p2060_p2 = scmp.ne.s32.totalorder %s2052_s19, 0 }
  0x5a   : > { %1349 = vmatmul.mubr.msk.bf16.vlgmr.msra.gmra.mxu1 %vm383_vm2, %v1884_v9  ;;  %1341 = vmatmul.mubr.msk.bf16.vlgmr.msra.gmra.mxu0 %vm383_vm2, %v370_v16  ;;  %v827_v42 = vsel %vm824_vm7, %v825_v37, %v826_v38  ;;  %s1704_s16 = smov [#allocation9]  }
  0x5b   : > { %1361 = vmatpush3.bf16.msra.mxu1 %v1504_v12  ;;  %1353 = vmatpush3.bf16.msra.mxu0 %v1503_v14  ;;  %v760_v43 = vsel %vm757_vm8, %v758_v40, %v759_v41  ;;  %p1611_p5 = pnand %p1610_p1, %p2060_p2  ;;  %s1613_s18 = sshll.u32 %s1704_s16, 4  ;;  %s1614_s18 = int_to_ptr.vmem [resolvable:$false] %s1613_s18 }
  0x5c   : > { %1362 = vmatprep.subr.bf16.mxu1 %v1702_v0  ;;  %1354 = vmatprep.subr.bf16.mxu0 %v1702_v0  ;;  %s1615_s20 = scalar_lea.vmem %s1614_s18, 512  ;;  %p1616_p4 = scmp.lt.s32.totalorder %s1985_s1, %s1614_s18 }
  0x5d   : > { %1356 = vmatprep.mubr.msk.bf16.mxu0 %vm1703_vm0, %v1702_v0  ;;  %1364 = vmatprep.mubr.msk.bf16.mxu1 %vm1703_vm0, %v1702_v0  ;;  %p1612_p3 = pneg %p1611_p5  ;;  %p1617_p8 = scmp.lt.s32.totalorder %s1615_s20, %s1609_s12 }
  0x5f   : > { %1363 = vmatpush3.bf16.msra.mxu1 %v1506_v15  ;;  %1355 = vmatpush3.bf16.msra.mxu0 %v1505_v17  ;;  %p1618_p10 = por %p1617_p8, %p1616_p4 }
  0x60   : > { %1376 = vmatprep.subr.bf16.mxu1 %v1702_v0  ;;  %1368 = vmatprep.subr.bf16.mxu0 %v1702_v0 }
  0x61   : > { %p1619_p11 = pnand %p1618_p10, %p1612_p3 }
  0x62   : > { %1365 = vmatmul.mubr.msk.bf16.vlgmr.msra.gmra.mxu1 %vm383_vm2, %v559_v22  ;;  %1357 = vmatmul.mubr.msk.bf16.vlgmr.msra.gmra.mxu0 %vm383_vm2, %v492_v24 }
  0x63   : > { %1377 = vmatpush3.bf16.msra.mxu1 %v1508_v23  ;;  %1369 = vmatpush3.bf16.msra.mxu0 %v1507_v25 }
  0x64   : > { %1378 = vmatprep.subr.bf16.mxu1 %v1702_v0  ;;  %1370 = vmatprep.subr.bf16.mxu0 %v1702_v0 }
  0x65   : > { %1372 = vmatprep.mubr.msk.bf16.mxu0 %vm1703_vm0, %v1702_v0  ;;  %1380 = vmatprep.mubr.msk.bf16.mxu1 %vm1703_vm0, %v1702_v0 }
  0x67   : > { %1379 = vmatpush3.bf16.msra.mxu1 %v1510_v26  ;;  %1371 = vmatpush3.bf16.msra.mxu0 %v1509_v29 }
  0x68   : > { %1392 = vmatprep.subr.bf16.mxu1 %v1702_v0  ;;  %1384 = vmatprep.subr.bf16.mxu0 %v1702_v0 }
  0x6a   : > { %1381 = vmatmul.mubr.msk.bf16.vlgmr.msra.gmra.mxu1 %vm383_vm2, %v693_v32  ;;  %1373 = vmatmul.mubr.msk.bf16.vlgmr.msra.gmra.mxu0 %vm383_vm2, %v626_v34 }
  0x6b   : > { %1393 = vmatpush3.bf16.msra.mxu1 %v1512_v33  ;;  %1385 = vmatpush3.bf16.msra.mxu0 %v1511_v35 }
  0x6c   : > { %1394 = vmatprep.subr.bf16.mxu1 %v1702_v0  ;;  %1386 = vmatprep.subr.bf16.mxu0 %v1702_v0 }
  0x6d   : > { %1388 = vmatprep.mubr.msk.bf16.mxu0 %vm1703_vm0, %v1702_v0  ;;  %1396 = vmatprep.mubr.msk.bf16.mxu1 %vm1703_vm0, %v1702_v0 }
  0x6f   : > { %1395 = vmatpush3.bf16.msra.mxu1 %v1514_v36  ;;  %1387 = vmatpush3.bf16.msra.mxu0 %v1513_v39 }
  0x70   : > { %1408 = vmatprep.subr.bf16.mxu1 %v1702_v0  ;;  %1400 = vmatprep.subr.bf16.mxu0 %v1702_v0 }
  0x72   : > { %1397 = vmatmul.mubr.msk.bf16.vlgmr.msra.gmra.mxu1 %vm383_vm2, %v827_v42  ;;  %1389 = vmatmul.mubr.msk.bf16.vlgmr.msra.gmra.mxu0 %vm383_vm2, %v760_v43 }
  0x73   : > { %1412 = vmatprep.mubr.msk.bf16.mxu1 %vm1703_vm0, %v1702_v0  ;;  %1401 = vmatpush3.bf16.msra.mxu0 %v1515_v44 }
  0x74   : > { %1404 = vmatprep.mubr.msk.bf16.mxu0 %vm1703_vm0, %v1702_v0  ;;  %1402 = vmatprep.subr.bf16.mxu0 %v1702_v0 }
  0x77   : > { %1403 = vmatpush3.bf16.msra.mxu0 %v1516_v45 }
  0x7a   : > { %1405 = vmatmul.mubr.msk.bf16.vlgmr.msra.gmra.mxu0 %vm383_vm2, %v1887_v10 }
 0x11a   : > { %v477_v46 = vpop.f32.mrf.mxu1  ;;  %v421_v47 = vpop.f32.mrf.mxu0 }
 0x11b   : > { %v478_v60 = vadd.f32 %v477_v46, %v421_v47 }
 0x11c   : > { %v1350_v48 = vpop.f32.mrf.mxu1  ;;  %v1342_v49 = vpop.f32.mrf.mxu0 }
 0x11e   : > { %v480_v50 = vpop.f32.mrf.mxu1  ;;  %v424_v51 = vpop.f32.mrf.mxu0 }
 0x11f   : > { %v481_v3 = vadd.f32 %v480_v50, %v424_v51 }
 0x120   : > { %v1351_v52 = vpop.f32.mrf.mxu1  ;;  %v1343_v53 = vpop.f32.mrf.mxu0 }
 0x122   : > { %v609_v54 = vpop.f32.mrf.mxu1  ;;  %v542_v55 = vpop.f32.mrf.mxu0 }
 0x123   : > { %v549_v63 = vadd.f32 %v542_v55, %v478_v60 }
 0x124   : > { %v1366_v56 = vpop.f32.mrf.mxu1  ;;  %v1358_v57 = vpop.f32.mrf.mxu0 }
 0x125   : > { %v616_v8 = vadd.f32 %v609_v54, %v549_v63  ;;  %v1518_v63 = vld [vmem:[#allocation7] sm:$0xff]  }
 0x126   : > { %v612_v58 = vpop.f32.mrf.mxu1  ;;  %v545_v59 = vpop.f32.mrf.mxu0 }
 0x127   : > { %v550_v9 = vadd.f32 %v545_v59, %v481_v3 }
 0x128   : > { %v1367_v61 = vpop.f32.mrf.mxu1  ;;  %v1359_v62 = vpop.f32.mrf.mxu0 }
 0x129   : > { %v617_v15 = vadd.f32 %v612_v58, %v550_v9  ;;  %v1517_v62 = vld [vmem:[#allocation7 + $0x8] sm:$0xff]  }
 0x12a   : > { %v743_v1 = vpop.f32.mrf.mxu1  ;;  %v676_v2 = vpop.f32.mrf.mxu0  ;;  %1409 = vmatpush3.bf16.msra.mxu1 %v1517_v62 }
 0x12b   : > { %v683_v12 = vadd.f32 %v676_v2, %v616_v8  ;;  %1410 = vmatprep.subr.bf16.mxu1 %v1702_v0  ;;  %v1291_v0 = vld [vmem:[%s2040_s4] ss:$0 sm:$0xff] }
 0x12c   : > { %v1382_v4 = vpop.f32.mrf.mxu1  ;;  %v1374_v5 = vpop.f32.mrf.mxu0 }
 0x12d   : > { %v750_v18 = vadd.f32 %v743_v1, %v683_v12 }
 0x12e   : > { %v746_v10 = vpop.f32.mrf.mxu1  ;;  %v679_v11 = vpop.f32.mrf.mxu0  ;;  %1411 = vmatpush3.bf16.msra.mxu1 %v1518_v63 }
 0x12f   : > { %v684_v19 = vadd.f32 %v679_v11, %v617_v15 }
 0x130   : > { %v1383_v13 = vpop.f32.mrf.mxu1  ;;  %v1375_v14 = vpop.f32.mrf.mxu0 }
 0x131   : > { %v751_v25 = vadd.f32 %v746_v10, %v684_v19  ;;  %v1290_v10 = vld [vmem:[%s2039_s3] ss:$0 sm:$0xff] }
 0x132   : > { %v877_v16 = vpop.f32.mrf.mxu1  ;;  %v810_v17 = vpop.f32.mrf.mxu0 }
 0x133   : > { %v817_v22 = vadd.f32 %v810_v17, %v750_v18 }
 0x134   : > { %v1398_v20 = vpop.f32.mrf.mxu1  ;;  %v1390_v21 = vpop.f32.mrf.mxu0 }
 0x135   : > { %v884_v28 = vadd.f32 %v877_v16, %v817_v22  ;;  %v1292_v21 = vld [vmem:[%s2042_s6] ss:$0 sm:$0xff] }
 0x136   : > { %v880_v23 = vpop.f32.mrf.mxu1  ;;  %v813_v24 = vpop.f32.mrf.mxu0 }
 0x137   : > { %v818_v29 = vadd.f32 %v813_v24, %v751_v25 }
 0x138   : > { %v1399_v26 = vpop.f32.mrf.mxu1  ;;  %v1391_v27 = vpop.f32.mrf.mxu0 }
 0x139   : > { %v885_v34 = vadd.f32 %v880_v23, %v818_v29 }
 0x13a   : > { %v940_v30 = vpop.f32.mrf.mxu0 }
 0x13b   : > { %v947_v32 = vadd.f32 %v940_v30, %v884_v28 }
 0x13c   : > { %v1406_v33 = vpop.f32.mrf.mxu0 }
 0x13d   : > { %v956_v35 = vadd.f32 %v1289_v31, %v947_v32 }
 0x13e   : > { %v943_v36 = vpop.f32.mrf.mxu0 }
 0x13f   : > { %v960_v37 = vmul.f32 0.70710677, %v956_v35  ;;  %v948_v38 = vadd.f32 %v943_v36, %v885_v34  ;;  %v958_v43 = vmul.f32 0.5, %v956_v35 }
 0x140   : > { %v1407_v39 = vpop.f32.mrf.mxu0 }
 0x141   : > { %1519 = verf.f32 %v960_v37  ;;  %v957_v40 = vadd.f32 %v1289_v31, %v948_v38 }
 0x143   : > { %v961_v41 = vmul.f32 0.70710677, %v957_v40  ;;  %v959_v48 = vmul.f32 0.5, %v957_v40 }
 0x145   : > { %1521 = verf.f32 %v961_v41 }
 0x14e   : > { %v1520_v42 = vpop.eup %1519 }
 0x14f   : > { %v964_v44 = vadd.f32 1.0, %v1520_v42 }
 0x151   : > { %v966_v45 = vmul.f32 %v964_v44, %v958_v43 }
 0x152   : > { %v1522_v46 = vpop.eup %1521 }
 0x153   : > { %v970_v47 = vsel %vm383_vm2, %v966_v45, 0.0  ;;  %v965_v49 = vadd.f32 1.0, %v1522_v46 }
 0x154   : > { %971 = vadd.xlane.f32.xlu0 %v970_v47 }
 0x155   : > { %v967_v50 = vmul.f32 %v965_v49, %v959_v48 }
 0x157   : > { %v973_v51 = vsel %vm383_vm2, %v967_v50, 0.0 }
 0x158   : > { %974 = vadd.xlane.f32.xlu0 %v973_v51 }
 0x1dd   : > { %v972_v52 = vpop.xlane.xlu0 %971 }
 0x1de   : > { %v977_v53 = vmul.f32 0.03125, %v972_v52 }
 0x1e0   : > { %v979_v54 = vsub.f32 %v966_v45, %v977_v53 }
 0x1e1   : > { %v975_v55 = vpop.xlane.xlu0 %974 }
 0x1e2   : > { %v978_v56 = vmul.f32 0.03125, %v975_v55  ;;  %v981_v57 = vmul.f32 %v979_v54, %v979_v54  ;;  %v1296_v55 = vld [vmem:[%s2043_s7] ss:$0 sm:$0xff] }
 0x1e4   : > { %v980_v58 = vsub.f32 %v967_v50, %v978_v56  ;;  %v983_v59 = vsel %vm383_vm2, %v981_v57, 0.0  ;;  %v1297_v57 = vld [vmem:[%s2044_s8] ss:$0 sm:$0xff] }
 0x1e5   : > { %984 = vadd.xlane.f32.xlu1 %v983_v59 }
 0x1e6   : > { %v982_v60 = vmul.f32 %v980_v58, %v980_v58 }
 0x1e8   : > { %v986_v61 = vsel %vm383_vm2, %v982_v60, 0.0 }
 0x1e9   : > { %987 = vadd.xlane.f32.xlu1 %v986_v61 }
 0x26e   : > { %v985_v1 = vpop.xlane.xlu1 %984 }
 0x26f   : > { %v989_v2 = vmul.f32 0.03125, %v985_v1 }
 0x271   : > { %v991_v3 = vadd.f32 1e-05, %v989_v2 }
 0x272   : > { %v988_v4 = vpop.xlane.xlu1 %987 }
 0x273   : > { %1523 = vrsqrt.f32 %v991_v3  ;;  %v990_v5 = vmul.f32 0.03125, %v988_v4 }
 0x275   : > { %v992_v8 = vadd.f32 1e-05, %v990_v5 }
 0x277   : > { %1525 = vrsqrt.f32 %v992_v8 }
 0x280   : > { %v1524_v9 = vpop.eup %1523 }
 0x281   : > { %v995_v11 = vmul.f32 %v1524_v9, %v979_v54 }
 0x283   : > { %v1003_v12 = vmul.f32 %v1290_v10, %v995_v11 }
 0x284   : > { %v1526_v13 = vpop.eup %1525 }
 0x285   : > { %v996_v14 = vmul.f32 %v1526_v13, %v980_v58  ;;  %v1011_v16 = vadd.f32 %v1291_v0, %v1003_v12 }
 0x287   : > { %v1004_v15 = vmul.f32 %v1290_v10, %v996_v14  ;;  %v1013_v18 = vadd.f32 %v1011_v16, %v1879_v6 }
 0x289   : > { %v1012_v17 = vadd.f32 %v1291_v0, %v1004_v15 }
 0x28b   : > { %v1014_v19 = vadd.f32 %v1012_v17, %v1881_v7 }
 0x28d   : > { %v1015_v20 = vpack.c.bf16 %v1014_v19, %v1013_v18 }
 0x28f   : > { %1413 = vmatmul.mubr.msk.bf16.vlgmr.msra.gmra.mxu1 %vm383_vm2, %v1015_v20 }
 0x34f   : > { %v1076_v22 = vpop.f32.mrf.mxu1 }
 0x350   : > { %v1077_v23 = vadd.f32 %v1292_v21, %v1076_v22 }
 0x351   : > { %v1414_v24 = vpop.f32.mrf.mxu1 }
 0x352   : > { %v1085_v25 = vmul.f32 0.70710677, %v1077_v23  ;;  %v1083_v30 = vmul.f32 0.5, %v1077_v23 }
 0x353   : > { %v1079_v26 = vpop.f32.mrf.mxu1 }
 0x354   : > { %1527 = verf.f32 %v1085_v25  ;;  %v1080_v27 = vadd.f32 %v1292_v21, %v1079_v26 }
 0x355   : > { %v1415_v28 = vpop.f32.mrf.mxu1 }
 0x356   : > { %v1086_v29 = vmul.f32 0.70710677, %v1080_v27  ;;  %v1084_v33 = vmul.f32 0.5, %v1080_v27 }
 0x358   : > { %1529 = verf.f32 %v1086_v29 }
 0x361   : > { %v1528_v6 = vpop.eup %1527 }
 0x362   : > { %v1089_v7 = vadd.f32 1.0, %v1528_v6 }
 0x364   : > { %v1091_v31 = vmul.f32 %v1089_v7, %v1083_v30 }
 0x365   : > { %v1530_v32 = vpop.eup %1529 }
 0x366   : > { %v1095_v34 = vsel %vm383_vm2, %v1091_v31, 0.0  ;;  %v1090_v35 = vadd.f32 1.0, %v1530_v32 }
 0x367   : > { %1096 = vadd.xlane.f32.xlu0 %v1095_v34 }
 0x368   : > { %v1092_v36 = vmul.f32 %v1090_v35, %v1084_v33 }
 0x36a   : > { %v1098_v37 = vsel %vm383_vm2, %v1092_v36, 0.0 }
 0x36b   : > { %1099 = vadd.xlane.f32.xlu1 %v1098_v37 }
 0x3f0   : > { %v1097_v38 = vpop.xlane.xlu0 %1096 }
 0x3f1   : > { %v1101_v39 = vmul.f32 0.03125, %v1097_v38 }
 0x3f3   : > { %v1103_v40 = vsub.f32 %v1091_v31, %v1101_v39 }
 0x3f4   : > { %v1100_v41 = vpop.xlane.xlu1 %1099 }
 0x3f5   : > { %v1102_v42 = vmul.f32 0.03125, %v1100_v41  ;;  %v1105_v43 = vmul.f32 %v1103_v40, %v1103_v40 }
 0x3f7   : > { %v1104_v44 = vsub.f32 %v1092_v36, %v1102_v42  ;;  %v1107_v45 = vsel %vm383_vm2, %v1105_v43, 0.0 }
 0x3f8   : > { %1108 = vadd.xlane.f32.xlu0 %v1107_v45 }
 0x3f9   : > { %v1106_v46 = vmul.f32 %v1104_v44, %v1104_v44 }
 0x3fb   : > { %v1110_v47 = vsel %vm383_vm2, %v1106_v46, 0.0 }
 0x3fc   : > { %1111 = vadd.xlane.f32.xlu1 %v1110_v47 }
 0x481   : > { %v1109_v48 = vpop.xlane.xlu0 %1108 }
 0x482   : > { %v1113_v49 = vmul.f32 0.03125, %v1109_v48 }
 0x484   : > { %v1115_v50 = vadd.f32 1e-05, %v1113_v49 }
 0x485   : > { %v1112_v51 = vpop.xlane.xlu1 %1111 }
 0x486   : > { %1531 = vrsqrt.f32 %v1115_v50  ;;  %v1114_v52 = vmul.f32 0.03125, %v1112_v51 }
 0x488   : > { %v1116_v53 = vadd.f32 1e-05, %v1114_v52 }
 0x48a   : > { %1533 = vrsqrt.f32 %v1116_v53 }
 0x493   : > { %v1532_v54 = vpop.eup %1531 }
 0x494   : > { %v1119_v56 = vmul.f32 %v1532_v54, %v1103_v40 }
 0x496   : > { %v1127_v58 = vmul.f32 %v1296_v55, %v1119_v56 }
 0x497   : > { %v1534_v59 = vpop.eup %1533 }
 0x498   : > { %v1135_v60 = vadd.f32 %v1297_v57, %v1127_v58  ;;  %v1120_v61 = vmul.f32 %v1534_v59, %v1104_v44 }
 0x49a   : > { %v1128_v62 = vmul.f32 %v1296_v55, %v1120_v61  ;;  %v1137_v63 = vadd.f32 %v1135_v60, %v1013_v18 }
 0x49c   : > { %v1136_v1 = vadd.f32 %v1297_v57, %v1128_v62  ;;  %1139 = vst.msk [vmem:[%s1869_s26] sm:$0xff] %vm383_vm2, %v1137_v63 }
 0x49e   : > { %v1138_v2 = vadd.f32 %v1136_v1, %v1014_v19 }
 0x4a0   : > { %1140 = vst.msk [vmem:[%s1869_s26 + $0x8] sm:$0xff] %vm383_vm2, %v1138_v2 }
 0x4a1   : > { %1622 = shalt.err (!%p1619_p11)
}
 0x4a2   : > { %s1623_s26 = scalar_lea.hbm %s1983_s23, 256  ;;  %s1627_s15 = scalar_lea.hbm %s2045_s9, 512 }
 0x4a3   : > { %p1624_p13 = scmp.ne.s32.totalorder %s1983_s23, %s1623_s26  ;;  %p1628_p7 = scmp.lt.s32.totalorder %s1983_s23, %s2045_s9 }
 0x4a4   : > { %p1629_p9 = scmp.lt.s32.totalorder %s1627_s15, %s1623_s26 }
 0x4a5   : > { %p1625_p0 = pnand %p1624_p13, %p2060_p2 }
 0x4a6   : > { %p1630_p12 = por %p1629_p9, %p1628_p7 }
 0x4a7   : > { %p1626_p6 = pneg %p1625_p0 }
 0x4a9   : > { %p1631_p1 = pnand %p1630_p12, %p1626_p6 }
 0x4ab   : > { %1634 = shalt.err (!%p1631_p1)
}
 0x4ac   : > { %s1705_s17 = smov 128   ;;  %s1706_s27 = smov 8  }
 0x4ad   : > { %1424 = dma.vmem_to_hbm [thread:$0]  (%p2060_p2), %s1985_s1, 256, %s1983_s23, %s1991_s29, %s1705_s17, %s1705_s17, %s1706_s27  }
 0x4ae PF: > { %p1441_p5 = scmp.ge.s32.totalorder %s1695_s14, 2  ;;  %s1172_s12 = sand.u32 1, %s1675_s30  }
 0x4af   : > { %p2061_p3 = scmp.ne.s32.totalorder %s2053_s21, 0  ;;  %s1173_s16 = scalar_lea.sflag [#allocation6], %s1172_s12 }
 0x4b1   : > { %p1434_p4 = pnand %p1441_p5, %p2061_p3 }
 0x4b3   : > { %p1435_p8 = pneg %p1434_p4 }
 0x4b5   : > { %1670 = dma.done.wait (%p1435_p8), %s1173_s16, 256  }
 0x4b6   : > { %1672 = vsyncadd (%p1435_p8), %s1173_s16, 4294967040  ;;  %s24_s14 = sadd.s32 1, %s1695_s14   ;;  %s2062_s19 = sld [smem:[#allocation18_spill]] }
 0x4b7   : > { %p21_p10 = scmp.ge.s32.totalorder %s24_s14, 4   ;;  %s2063_s30 = smov %s1679_s10 }
 0x4b8   : > { %s2064_s10 = smov %s1683_s11  ;;  %s2065_s11 = smov %s1810_s22 }
 0x4b9   : > { %s2066_s12 = smov %s1691_s13  ;;  %23 = sbr.rel (!%p21_p10) target bundleno = 9 (0x9), region = 106 }
 0x4bc   : > { %s2067_s13 = smov %s2062_s19 }
 0x4be   :  { %1178 = vsyncpa [#allocation5], 1 }
 0x4bf   :  { %1180 = vsyncpa [#allocation5 + $0x1], 1 }
 0x4c0   :  { %1181 = vsyncpa [#allocation8], 1 }
 0x4c1   :  { %1182 = vsyncpa [#allocation6], 1 }
 0x4c2   :  { %1184 = vsyncpa [#allocation6 + $0x1], 1 }
 0x4c3   :  { %1185 = vsyncmov [#allocation3] }
 0x4c6   :  { %s1186_s21 = vpop.sfrf %1185 }
 0x4c7   :  { %p1303_p2 = scmp.ne.s32.totalorder %s1186_s21, 0 }
 0x4c9   :  { %1190 = shalt.err (%p1303_p2)  }

</bundles_post_ra>
